<compile_context>
chip_gen: v7x
topology: tpu7x:2x2x1
jax: 0.10.0
libtpu: 0.0.40
codegen_flags: <defaults>
</compile_context>

<pallas_src>
import math

import jax
import jax.numpy as jnp
from jax.experimental import pallas as pl
from jax.experimental.pallas import tpu as pltpu


# ----------------------------------------------------------------------------
# Hardware-aware block sizing
# ----------------------------------------------------------------------------
def _vmem_capacity_bytes() -> int:
    try:
        info = pltpu.get_tpu_info()
        cap = int(getattr(info, "vmem_capacity_bytes", 0))
        if cap > 0:
            return cap
    except Exception:
        pass
    return 128 << 20  # v5e / v6e default


def _target_block_bytes() -> int:
    # One (double-buffered) output array -> ~2x block resident; leave headroom.
    # 128 MiB VMEM (v5e/v6e) -> 16 MiB blocks; 64 MiB (v7x) -> 8 MiB blocks.
    cap = _vmem_capacity_bytes()
    return int(min(16 << 20, max(2 << 20, cap // 8)))


def _choose_tile_rows(folded_len: int, width: int, itemsize: int,
                      target_bytes: int) -> int:
    rows = target_bytes // max(1, width * itemsize)
    rows -= rows % 8
    rows = max(8, rows)
    if folded_len <= rows:
        return folded_len          # full dim -> always a legal block shape
    return rows                    # multiple of 8 -> legal; last block may be partial


def _fold_factor(seq_len: int, hidden_dim: int) -> int:
    """Fold rows into lanes so the stored row width is a multiple of 128."""
    if hidden_dim % 128 == 0:
        return 1
    f = 128 // math.gcd(hidden_dim, 128)
    if seq_len % f == 0:
        return f
    # TODO(synk): seq_len not divisible by the fold factor falls back to the
    # narrow (masked-store) layout; still correct, just slower stores.
    return 1


# ----------------------------------------------------------------------------
# Sinusoidal table kernel.
#   pe[p, i]   = sin(p * 10000^(-i/H))        (even i)
#   pe[p, i+1] = cos(p * 10000^(-i/H))        (same frequency as column i)
# Folded view: flat element (r, l) of the (S/fold, fold*H) output is
#   p = r*fold + l//H,  i = l%H
# and the whole per-lane structure is pre-baked into scale/bias rows:
#   arg = p*inv_freq + phase = r*(fold*inv_freq) + ((l//H)*inv_freq + phase)
# so the kernel does exactly one mul, one add, and one sin per element.
# ----------------------------------------------------------------------------
def _sinusoid_pe_kernel(scale_ref, bias_ref, o_ref):
    rows, _ = o_ref.shape
    r0 = pl.program_id(0) * rows
    r = (r0 + jax.lax.broadcasted_iota(jnp.int32, (rows, 1), 0)).astype(jnp.float32)
    o_ref[...] = jnp.sin(r * scale_ref[...] + bias_ref[...]).astype(o_ref.dtype)


def _column_rows(hidden_dim: int, fold: int):
    """(1, fold*H) scale/bias rows, computed once in the wrapper (hoisted)."""
    width = fold * hidden_dim
    lane = jnp.arange(width, dtype=jnp.int32)
    h = lane % hidden_dim
    off = (lane // hidden_dim).astype(jnp.float32)
    even = (h - (h % 2)).astype(jnp.float32)
    inv_freq = jnp.exp(even * jnp.float32(-math.log(10000.0) / hidden_dim))
    phase = jnp.where((h % 2) == 0, 0.0, math.pi / 2.0).astype(jnp.float32)
    scale = (jnp.float32(fold) * inv_freq)[None, :]       # (1, W)
    bias = (off * inv_freq + phase)[None, :]               # (1, W)
    return scale, bias


def sinusoid_pe(seq_len: int, hidden_dim: int, dtype=jnp.float32) -> jax.Array:
    """Returns the (1, seq_len, hidden_dim) sinusoidal positional-encoding table."""
    assert hidden_dim % 2 == 0, "PositionalEncoding requires an even hidden_dim"

    fold = _fold_factor(seq_len, hidden_dim)
    folded_len = seq_len // fold
    width = fold * hidden_dim
    itemsize = jnp.dtype(dtype).itemsize

    tile_r = _choose_tile_rows(folded_len, width, itemsize, _target_block_bytes())
    tile_bytes = tile_r * width * itemsize
    vmem_limit = int(min(_vmem_capacity_bytes() // 2,
                         max(32 << 20, 2 * tile_bytes + (4 << 20))))

    scale, bias = _column_rows(hidden_dim, fold)
    grid = (pl.cdiv(folded_len, tile_r),)

    out = pl.pallas_call(
        _sinusoid_pe_kernel,
        out_shape=jax.ShapeDtypeStruct((folded_len, width), dtype),
        grid=grid,
        in_specs=[pl.BlockSpec((1, width), lambda i: (0, 0)),   # resident constants
                  pl.BlockSpec((1, width), lambda i: (0, 0))],
        out_specs=pl.BlockSpec((tile_r, width), lambda i: (i, 0)),
        compiler_params=pltpu.CompilerParams(
            dimension_semantics=("parallel",),   # v7x: shard rows across 2 TCs
            vmem_limit_bytes=vmem_limit),
    )(scale, bias)

    # Contiguous reshape back to (S, H); done once at init.
    return out.reshape(seq_len, hidden_dim)[None, :, :]


# ----------------------------------------------------------------------------
# Module-equivalent wrapper
# ----------------------------------------------------------------------------
class PositionalEncoding:
    def __init__(self, max_len: int, hidden_dim: int, pos_encoding: bool,
                 key=None, dtype=jnp.float32):
        self.max_len = max_len
        self.hidden_dim = hidden_dim
        self.pos_encoding = pos_encoding
        if pos_encoding:
            # Constant table: built once (as PyTorch does in __init__) by the kernel.
            self.pe = sinusoid_pe(max_len, hidden_dim, dtype=dtype)   # (1, max_len, H)
        else:
            # nn.Embedding(max_len, hidden_dim) default init: N(0, 1).
            if key is None:
                key = jax.random.PRNGKey(0)
            self.emb_table = jax.random.normal(
                key, (max_len, hidden_dim), dtype=jnp.float32).astype(dtype)

    def __call__(self, x: jax.Array) -> jax.Array:
        # x: (B, S, H) — only S is used, matching the PyTorch forward.
        # Both paths are pure slices of a resident table; when called under the
        # caller's jit, XLA fuses them into the downstream `x + pe` for free.
        seq_len = x.shape[1]
        if self.pos_encoding:
            return self.pe[:, :seq_len]
        # pos = arange(max_len) -> emb(pos)[:, :S] is an identity row gather ==
        # the first S rows of the table. No kernel: a fused slice is the fix.
        return self.emb_table[None, :seq_len, :]


# ----------------------------------------------------------------------------
# Reference (pure JAX, mirrors the PyTorch loop) to validate the kernel
# ----------------------------------------------------------------------------
def sinusoid_pe_ref(max_len, hidden_dim, seq_len):
    pos = jnp.arange(max_len, dtype=jnp.float32)
    pe = jnp.zeros((max_len, hidden_dim), dtype=jnp.float32)
    for i in range(0, hidden_dim, 2):
        ang = pos / (10000.0 ** (i / hidden_dim))
        pe = pe.at[:, i].set(jnp.sin(ang))
        pe = pe.at[:, i + 1].set(jnp.cos(ang))
    return pe[None, :seq_len, :]


if __name__ == "__main__":
    key = jax.random.PRNGKey(0)
    k_x, k_emb = jax.random.split(key)

    batch, seq, max_len, hidden = 2, 8, 16, 32
    x = jax.random.normal(k_x, (batch, seq, hidden), dtype=jnp.float32)  # (B, S, H)

    # --- sinusoidal path (H=32 -> lane-folded kernel, 128-wide stores) ---
    mod_sin = PositionalEncoding(max_len, hidden, pos_encoding=True)
    pe_out = jax.block_until_ready(mod_sin(x))
    assert pe_out.shape == (1, seq, hidden), pe_out.shape
    ref = sinusoid_pe_ref(max_len, hidden, seq)
    assert jnp.allclose(pe_out, ref, atol=1e-5), float(jnp.max(jnp.abs(pe_out - ref)))

    # --- sinusoidal path, H multiple of 128 (no folding), seq not multiple of 8 ---
    pe2 = jax.block_until_ready(sinusoid_pe(40, 128))
    assert pe2.shape == (1, 40, 128), pe2.shape
    ref2 = sinusoid_pe_ref(40, 128, 40)
    assert jnp.allclose(pe2, ref2, atol=1e-5), float(jnp.max(jnp.abs(pe2 - ref2)))

    # --- learned embedding path (pure slice; no kernel by design) ---
    mod_emb = PositionalEncoding(max_len, hidden, pos_encoding=False, key=k_emb)
    emb_out = jax.block_until_ready(mod_emb(x))
    assert emb_out.shape == (1, seq, hidden), emb_out.shape
    assert jnp.allclose(emb_out[0], mod_emb.emb_table[:seq], atol=0.0)

    print("KERNEL_OK")
</pallas_src>

<mosaic_0001>
module attributes {stable_mosaic.version = 11 : i64} {
  func.func @_sinusoid_pe_kernel(%arg0: i32, %arg1: memref<1x128xf32, #tpu.memory_space<vmem>>, %arg2: memref<1x128xf32, #tpu.memory_space<vmem>>, %arg3: memref<4x128xf32, #tpu.memory_space<vmem>>) attributes {dimension_semantics = [#tpu.dimension_semantics<parallel>], iteration_bounds = array<i64: 1>, scalar_prefetch = 0 : i64, scratch_operands = 0 : i64, tpu.core_type = #tpu.core_type<tc>, window_params = [{pipeline_mode = #tpu.pipeline_mode<synchronous>, transform_indices = @transform_0, window_bounds = array<i64: 1, 128>}, {pipeline_mode = #tpu.pipeline_mode<synchronous>, transform_indices = @transform_1, window_bounds = array<i64: 1, 128>}, {transform_indices = @transform_2, window_bounds = array<i64: 4, 128>}]} {
    %c4_i32 = arith.constant 4 : i32
    %0 = arith.muli %arg0, %c4_i32 : i32
    %1 = tpu.iota {dimensions = array<i32: 0>} : vector<4x1xi32>
    %2 = vector.broadcast %0 : i32 to vector<4x1xi32>
    %3 = arith.addi %2, %1 : vector<4x1xi32>
    %4 = arith.sitofp %3 : vector<4x1xi32> to vector<4x1xf32>
    %c0 = arith.constant 0 : index
    %c0_0 = arith.constant 0 : index
    %5 = vector.load %arg1[%c0, %c0_0] : memref<1x128xf32, #tpu.memory_space<vmem>>, vector<1x128xf32>
    %6 = vector.broadcast %4 : vector<4x1xf32> to vector<4x128xf32>
    %7 = vector.broadcast %5 : vector<1x128xf32> to vector<4x128xf32>
    %8 = arith.mulf %6, %7 : vector<4x128xf32>
    %c0_1 = arith.constant 0 : index
    %c0_2 = arith.constant 0 : index
    %9 = vector.load %arg2[%c0_1, %c0_2] : memref<1x128xf32, #tpu.memory_space<vmem>>, vector<1x128xf32>
    %10 = vector.broadcast %9 : vector<1x128xf32> to vector<4x128xf32>
    %11 = arith.addf %8, %10 : vector<4x128xf32>
    %12 = math.sin %11 : vector<4x128xf32>
    %c0_3 = arith.constant 0 : index
    %c0_4 = arith.constant 0 : index
    %13 = vector.load %arg3[%c0_3, %c0_4] : memref<4x128xf32, #tpu.memory_space<vmem>>, vector<4x128xf32>
    tpu.vector_store %arg3[%c0_3, %c0_4], %12 {strides = array<i32>} : memref<4x128xf32, #tpu.memory_space<vmem>>, vector<4x128xf32>,
    return
  }
  func.func @transform_0(%arg0: i32) -> (i32, i32) {
    %c0_i32 = arith.constant 0 : i32
    %c0_i32_0 = arith.constant 0 : i32
    %c0_i32_1 = arith.constant 0 : i32
    return %c0_i32, %c0_i32_0 : i32, i32
  }
  func.func @transform_1(%arg0: i32) -> (i32, i32) {
    %c0_i32 = arith.constant 0 : i32
    %c0_i32_0 = arith.constant 0 : i32
    %c0_i32_1 = arith.constant 0 : i32
    return %c0_i32, %c0_i32_0 : i32, i32
  }
  func.func @transform_2(%arg0: i32) -> (i32, i32) {
    %c0_i32 = arith.constant 0 : i32
    %c0_i32_0 = arith.constant 0 : i32
    return %arg0, %c0_i32 : i32, i32
  }
}

</mosaic_0001>

<bundles_post_ra>
// kernel: tpu_custom_call.1
= control target key start
LH: loop header
LB: loop body
LE: loop exit
PB: predicated region body
PF: predicated region fallthrough
CT: control target
= control target key end

     0   :  { %7 = vsyncpa [#allocation3], 0  ;;  %s307_s0 = inlined_call_operand.hbm [shape: f32[1,128], index: 0, kind: input, shape index: {}]   ;;  %s308_s1 = inlined_call_operand.vmem [shape: f32[1,128], index: 1, kind: input, shape index: {}]   ;;  %s309_s2 = inlined_call_operand.hbm [shape: f32[4,128], index: 2, kind: output, shape index: {}]  }
   0x1   :  { %8 = vsyncpa [#allocation4], 0  ;;  %s236_s9 = smov [#allocation2]   ;;  %s188_s13 = scalar_lea.hbm %s307_s0, 16 }
   0x2   :  { %s15_s10 = sshll.u32 %s236_s9, 4  ;;  %p189_p0 = scmp.ne.s32.totalorder %s307_s0, %s188_s13  ;;  %s16_s10 = int_to_ptr.vmem [resolvable:$true] %s15_s10 }
   0x3   :  { %p192_p1 = scmp.lt.u32.totalorder %s188_s13, %s307_s0 }
   0x5   :  { %p194_p2 = pnand %p192_p1, %p189_p0 }
   0x7   :  { %197 = shalt.err (!%p194_p2)
}
   0x8   :  { %s198_s18 = scalar_lea.vmem %s16_s10, 16  ;;  %s202_s19 = scalar_lea.vmem %s16_s10, 32 }
   0x9   :  { %p199_p3 = scmp.ne.s32.totalorder %s16_s10, %s198_s18  ;;  %p203_p4 = scmp.lt.s32.totalorder %s16_s10, %s16_s10 }
   0xa   :  { %p204_p5 = scmp.lt.s32.totalorder %s202_s19, %s198_s18 }
   0xc   :  { %p205_p6 = por %p204_p5, %p203_p4 }
   0xe   :  { %p206_p7 = pnand %p205_p6, %p199_p3 }
  0x10   :  { %209 = shalt.err (!%p206_p7)
}
  0x11   :  { %18 = dma.hbm_to_vmem [thread:$0]  %s307_s0, 16, %s16_s10, [#allocation3]  }
  0x12   :  { %232 = dma.done.wait [#allocation3], 16  }
  0x13   :  { %233 = vsyncadd [#allocation3], 4294967280  ;;  %v25_v0 = vlaneseq  ;;  %v166_v3 = vld [vmem:[#allocation2] ss:$0 sm:$0xff]  ;;  %v237_v18 = vmov 683565275  }
  0x14   :  { %v167_v4 = vld [vmem:[%s308_s1] ss:$0 sm:$0xff]  ;;  %v238_v20 = vmov 2475754826   ;;  %v239_v22 = vmov 2131351028  }
  0x15   :  { %v26_v1 = vshrl.u32 %v25_v0, 7  ;;  %v240_v24 = vmov 2102212464   ;;  %v241_v26 = vmov 920167782   ;;  %s243_s0 = smov [#allocation5]  }
  0x16   :  { %v242_v33 = vmov 1326507024   ;;  %s157_s1 = sshll.u32 %s243_s0, 4  ;;  %s158_s1 = int_to_ptr.vmem [resolvable:$true] %s157_s1 }
  0x17   :  { %v29_v2 = vcvt.s32.f32 %v26_v1  ;;  %s210_s24 = scalar_lea.vmem %s158_s1, 64  ;;  %p215_p9 = scmp.lt.s32.totalorder %s158_s1, %s158_s1 }
  0x18   :  { %p211_p8 = scmp.ne.s32.totalorder %s158_s1, %s210_s24  ;;  %p216_p10 = scmp.lt.s32.totalorder %s210_s24, %s210_s24 }
  0x19   :  { %v37_v5 = vmul.f32 %v166_v3, %v29_v2 }
  0x1a   :  { %p217_p11 = por %p216_p10, %p215_p9 }
  0x1b   :  { %v274_v6 = vadd.f32 %v167_v4, %v37_v5 }
  0x1c   :  { %p218_p12 = pnand %p217_p11, %p211_p8 }
  0x1d   :  { %v49_v7 = vand.u32 2139095040, %v274_v6  ;;  %v46_v9 = vand.u32 2147483647, %v274_v6  ;;  %vm48_vm7 = vcmp.lt.s32.totalorder %v274_v6, 0  ;;  %vm138_vm12 = vweird.f32 %v274_v6 }
  0x1f   :  { %v50_v8 = vshrl.u32 %v49_v7, 23  ;;  %v53_v12 = vand.u32 8388607, %v46_v9  ;;  %vm47_vm8 = vcmp.le.f32.partialorder %v46_v9, 0.7853982 }
  0x21   :  { %v168_v10 = vadd.s32 4294967169, %v50_v8  ;;  %v54_v15 = vor.u32 8388608, %v53_v12 }
  0x23   :  { %v56_v11 = vadd.s32 1, %v168_v10  ;;  %v94_v35 = vshll.u32 %v54_v15, 8 }
  0x25   :  { %vm57_vm0 = vcmp.gt.s32.totalorder %v56_v11, 0 }
  0x26   :  { %v58_v13 = vsel %vm57_vm0, %v56_v11, 0 }
  0x27   :  { %v60_v14 = vand.u32 31, %v58_v13  ;;  %v59_v16 = vshrl.u32 %v58_v13, 5 }
  0x29   :  { %v61_v17 = vsub.s32 32, %v60_v14  ;;  %v63_v19 = vshll.u32 %v237_v18, %v60_v14  ;;  %v66_v21 = vshll.u32 %v238_v20, %v60_v14  ;;  %v69_v23 = vshll.u32 %v239_v22, %v60_v14 }
  0x2a   :  { %v72_v25 = vshll.u32 %v240_v24, %v60_v14  ;;  %v75_v27 = vshll.u32 %v241_v26, %v60_v14  ;;  %vm78_vm1 = vcmp.lt.s32.totalorder %v59_v16, 1  ;;  %vm81_vm2 = vcmp.lt.s32.totalorder %v59_v16, 4 }
  0x2b   :  { %v62_v28 = vshrl.u32 %v237_v18, %v61_v17  ;;  %v64_v29 = vshrl.u32 %v238_v20, %v61_v17  ;;  %v67_v30 = vshrl.u32 %v239_v22, %v61_v17  ;;  %v70_v31 = vshrl.u32 %v240_v24, %v61_v17 }
  0x2c   :  { %v73_v32 = vshrl.u32 %v241_v26, %v61_v17  ;;  %v76_v34 = vshrl.u32 %v242_v33, %v61_v17  ;;  %vm79_vm3 = vcmp.lt.s32.totalorder %v59_v16, 2  ;;  %vm80_vm4 = vcmp.lt.s32.totalorder %v59_v16, 3 }
  0x2d   :  { %v65_v36 = vor.u32 %v64_v29, %v63_v19  ;;  %v68_v37 = vor.u32 %v67_v30, %v66_v21  ;;  %v71_v38 = vor.u32 %v70_v31, %v69_v23 }
  0x2e   :  { %v74_v39 = vor.u32 %v73_v32, %v72_v25  ;;  %v77_v40 = vor.u32 %v76_v34, %v75_v27 }
  0x2f   :  { %v82_v41 = vsel %vm78_vm1, %v62_v28, %v65_v36  ;;  %v83_v42 = vsel %vm81_vm2, %v71_v38, 2102212464  ;;  %v86_v43 = vsel %vm78_vm1, %v65_v36, %v68_v37  ;;  %v90_v44 = vsel %vm78_vm1, %v68_v37, %v71_v38 }
  0x30   :  { %v84_v45 = vsel %vm80_vm4, %v68_v37, %v83_v42  ;;  %v87_v46 = vsel %vm81_vm2, %v74_v39, 920167782  ;;  %v91_v47 = vsel %vm81_vm2, %v77_v40, 1326507024 }
  0x31   :  { %v88_v48 = vsel %vm80_vm4, %v71_v38, %v87_v46  ;;  %v92_v49 = vsel %vm80_vm4, %v74_v39, %v91_v47  ;;  %v85_v50 = vsel %vm79_vm3, %v82_v41, %v84_v45 }
  0x32   :  { %v89_v51 = vsel %vm79_vm3, %v86_v43, %v88_v48  ;;  %v93_v52 = vsel %vm79_vm3, %v90_v44, %v92_v49  ;;  %v101_v57 = vmul.u32 %v94_v35, %v85_v50 }
  0x33   :  { %v280_v53 = vmul.u32.u64.low %v94_v35, %v93_v52  ;;  %v281_v54 = vmul.u32.u64.high %v94_v35, %v93_v52, %v280_v53  ;;  %v283_v55 = vmul.u32.u64.low %v94_v35, %v89_v51  ;;  %v284_v56 = vmul.u32.u64.high %v94_v35, %v89_v51, %v283_v55 }
  0x35   :  { %vm103_vm5 = vc.u32 %v281_v54, %v283_v55  ;;  %v104_v58 = vadd.s32 1, %v284_v56  ;;  %v102_v5 = vadd.s32 %v283_v55, %v281_v54 }
  0x37   :  { %v105_v59 = vsel %vm103_vm5, %v104_v58, %v284_v56 }
  0x38   :  { %v106_v60 = vadd.s32 %v105_v59, %v101_v57 }
  0x3a   :  { %v107_v61 = vadd.s32 536870912, %v106_v60 }
  0x3c   :  { %v108_v62 = vshrl.u32 %v107_v61, 30 }
  0x3e   :  { %v109_v63 = vshll.u32 %v108_v62, 30  ;;  %v132_v19 = vsub.s32 4, %v108_v62 }
  0x40   :  { %v110_v0 = vsub.s32 %v106_v60, %v109_v63  ;;  %v133_v22 = vsel %vm48_vm7, %v132_v19, %v108_v62 }
  0x41   :  { %v135_v25 = vsel %vm47_vm8, 0, %v133_v22 }
  0x42   :  { %v112_v1 = vsub.s32 0, %v110_v0  ;;  %v139_v26 = vadd.s32 3, %v135_v25 }
  0x44   :  { %v169_v2 = vmin.u32 %v112_v1, %v110_v0  ;;  %v140_v27 = vand.u32 3, %v139_v26 }
  0x46   :  { %v114_v3 = vclz %v169_v2  ;;  %vm145_vm9 = vcmp.eq.s32.totalorder %v140_v27, 2  ;;  %vm142_vm10 = vcmp.eq.s32.totalorder %v140_v27, 0  ;;  %vm141_vm11 = vcmp.lt.s32.totalorder %v140_v27, 2 }
  0x48   :  { %v170_v4 = vadd.s32 4294967294, %v114_v3 }
  0x4a   :  { %vm171_vm6 = vcmp.lt.s32.totalorder %v170_v4, 0 }
  0x4b   :  { %v117_v7 = vsel %vm171_vm6, 0, %v170_v4 }
  0x4c   :  { %v118_v8 = vsub.s32 32, %v117_v7  ;;  %v119_v10 = vshll.u32 %v110_v0, %v117_v7  ;;  %v122_v11 = vsub.s32 4294967266, %v117_v7 }
  0x4e   :  { %v120_v12 = vshrl.u32 %v102_v5, %v118_v8  ;;  %v123_v13 = vadd.s32 127, %v122_v11 }
  0x50   :  { %v121_v14 = vor.u32 %v120_v12, %v119_v10  ;;  %v124_v15 = vshll.u32 %v123_v13, 23 }
  0x52   :  { %v125_v16 = vor.u32 4788187, %v124_v15  ;;  %v128_v17 = vcvt.s32.f32 %v121_v14 }
  0x54   :  { %v126_v18 = vand.u32 2147483647, %v125_v16 }
  0x56   :  { %v129_v20 = vmul.f32 %v128_v17, %v126_v18 }
  0x58   :  { %v130_v21 = vxor.u32 2147483648, %v129_v20 }
  0x5a   :  { %v131_v23 = vsel %vm48_vm7, %v130_v21, %v129_v20 }
  0x5b   :  { %v134_v24 = vsel %vm47_vm8, %v274_v6, %v131_v23 }
  0x5c   :  { %184 = vcosq.f32 %v134_v24 }
  0x5d   :  { %186 = vsinq.f32 %v134_v24 }
  0x66   :  { %v185_v28 = vpop.eup %184 }
  0x67   :  { %v187_v29 = vpop.eup %186  ;;  %v146_v30 = vxor.u32 2147483648, %v185_v28 }
  0x68   :  { %v143_v31 = vxor.u32 2147483648, %v187_v29 }
  0x69   :  { %v147_v9 = vsel %vm145_vm9, %v146_v30, %v187_v29 }
  0x6a   :  { %v144_v32 = vsel %vm142_vm10, %v185_v28, %v143_v31 }
  0x6b   :  { %v148_v33 = vsel %vm141_vm11, %v144_v32, %v147_v9 }
  0x6c   :  { %v149_v34 = vsel %vm138_vm12, nan, %v148_v33 }
  0x6d   :  { %150 = vst [vmem:[#allocation5] sm:$0xf] %v149_v34 }
  0x6e   :  { %221 = shalt.err (!%p218_p12)
}
  0x6f   :  { %s222_s27 = scalar_lea.hbm %s309_s2, 64 }
  0x70   :  { %p223_p13 = scmp.ne.s32.totalorder %s309_s2, %s222_s27  ;;  %p226_p0 = scmp.lt.u32.totalorder %s222_s27, %s309_s2 }
  0x72   :  { %p228_p1 = pnand %p226_p0, %p223_p13 }
  0x74   :  { %231 = shalt.err (!%p228_p1)
}
  0x75   :  { %160 = dma.vmem_to_hbm [thread:$0]  %s158_s1, 64, %s309_s2, [#allocation4]  }
  0x76   :  { %234 = dma.done.wait [#allocation4], 64  }
  0x77   :  { %235 = vsyncadd [#allocation4], 4294967232 }
  0x78   :  { %164 = vsyncpa [#allocation3], 1 }
  0x79   :  { %165 = vsyncpa [#allocation4], 1 }

</bundles_post_ra>
